<compile_context>
chip_gen: v5e
topology: v5e:2x2
jax: 0.10.0
libtpu: 0.0.40
codegen_flags: <defaults>
</compile_context>

<pallas_src>
import functools

import jax
import jax.numpy as jnp
from jax.experimental import pallas as pl
from jax.experimental.pallas import tpu as pltpu


def _vmem_settings():
    """Per-generation (input-tile bytes, vmem_limit_bytes)."""
    try:
        info = pltpu.get_tpu_info()
        vmem_phys = getattr(info, "vmem_capacity_bytes", None)
    except Exception:  # query unavailable -> conservative settings
        vmem_phys = None
    if vmem_phys is not None and vmem_phys >= 100 * 1024 * 1024:
        # v5e / v6e: 128 MiB physical VMEM -> bigger tiles, fewer grid steps.
        return 8 * 1024 * 1024, 64 * 1024 * 1024
    # v7x (64 MiB physical per TC) or unknown: stay conservative.
    return 4 * 1024 * 1024, 32 * 1024 * 1024


def _choose_block_rows(nc, hw, itemsize, tile_bytes):
    """Rows per block: multiple of 8 (or the full nc), ~tile_bytes per input.

    Prefers a row count that divides nc (skips the per-step tail mask) as long
    as it does not shrink the tile below half the target size.
    """
    max_rows = max(8, (tile_bytes // (hw * itemsize) // 8) * 8)
    if nc <= max_rows:
        return nc  # full leading dim: always a legal block
    for cand in range(max_rows, max(7, max_rows // 2 - 1), -8):
        if nc % cand == 0:
            return cand
    return max_rows


def _l1grad_kernel(p_ref, t_ref, mh_ref, mv_ref, out_ref, acc_ref, *,
                   w, nc, tb, steps_per_core, inv_count, mask_tail):
    """One grid step: accumulate |grad_h| + |grad_v| of (p - t) for TB images.

    p_ref, t_ref : (TB, H*W) flattened image blocks.
    mh_ref,mv_ref: (1, H*W)  hoisted 0/1 lane masks for the two diffs.
    out_ref      : (1, 128)  per-core partial, written only on the last step.
    acc_ref      : (TB, 128) or (TB, 1) f32 scratch, resident across steps.
    """
    i = pl.program_id(1)

    @pl.when(i == 0)
    def _init():
        acc_ref[...] = jnp.zeros_like(acc_ref)

    # Upcast to f32 (no-op for f32 inputs; mandatory on v5e for bf16 inputs).
    d = p_ref[...].astype(jnp.float32) - t_ref[...].astype(jnp.float32)

    if mask_tail:
        # Zero rows past the real N*C extent (padded tail block and phantom
        # blocks of the core split).  Select, not multiply: padded rows may
        # hold arbitrary bits / NaNs.
        blk = pl.program_id(0) * steps_per_core + i
        row = jax.lax.broadcasted_iota(jnp.int32, (tb, 1), 0) + blk * tb
        d = jnp.where(row < nc, d, 0.0)

    # H-direction diff: flat[k] - flat[k-W], valid for k >= W (mask_h).
    gh = jnp.abs(d - pltpu.roll(d, shift=w, axis=1)) * mh_ref[...]
    # W-direction diff: flat[k] - flat[k-1], valid for k % W != 0 (mask_v).
    gv = jnp.abs(d - pltpu.roll(d, shift=1, axis=1)) * mv_ref[...]
    g = gh + gv

    hw = g.shape[-1]
    acc_cols = acc_ref.shape[-1]
    if acc_cols == 1:
        # Lane-reduce per step (XLU has slack: only two rolls above).
        acc_ref[...] += jnp.sum(g, axis=1, keepdims=True)
    else:
        # Fold vreg-aligned 128-lane column slices with plain VPU adds.
        s = g[:, 0:acc_cols]
        for k in range(1, hw // acc_cols):
            s = s + g[:, k * acc_cols:(k + 1) * acc_cols]
        acc_ref[...] += s

    @pl.when(i == pl.num_programs(1) - 1)
    def _finalize():
        col = jnp.sum(acc_ref[...], axis=1, keepdims=True)   # (TB, 1)
        total = jnp.sum(col, axis=0, keepdims=True)          # (1, 1)
        out_ref[...] = jnp.broadcast_to(total * inv_count, out_ref.shape)


def l1_grad_loss(prediction, target):
    """Pallas equivalent of L1Grad.forward(prediction, target)."""
    N, C, H, W = prediction.shape
    assert target.shape == prediction.shape
    assert H == W, "fast_grad's concat requires square spatial dims"

    nc, hw = N * C, H * W
    # Lane-dense layout: one image per row of length H*W (contiguous reshape).
    p = prediction.reshape(nc, hw)
    t = target.reshape(nc, hw)

    tile_bytes, vmem_limit = _vmem_settings()
    tb = _choose_block_rows(nc, hw, p.dtype.itemsize, tile_bytes)
    total_blocks = pl.cdiv(nc, tb)

    # Shard the reduction over two TensorCores via a parallel leading grid
    # axis (v7x); a single-core chip simply runs the axis serially.
    num_cores = 2 if total_blocks >= 2 else 1
    steps_per_core = pl.cdiv(total_blocks, num_cores)
    mask_tail = (num_cores * steps_per_core * tb) != nc

    if num_cores * steps_per_core == total_blocks:
        def blk_idx(c, i):
            return c * steps_per_core + i
    else:
        # Phantom blocks past the last real block are clamped to a valid block
        # index (cheap scalar op) and fully zeroed by the in-kernel row mask.
        def blk_idx(c, i):
            return jnp.minimum(c * steps_per_core + i, total_blocks - 1)

    acc_cols = 128 if hw % 128 == 0 else 1

    # Hoisted, loop-invariant lane masks (tiny constant-index inputs).
    lane = jnp.arange(hw, dtype=jnp.int32)
    mask_h = (lane >= W).astype(jnp.float32).reshape(1, hw)
    mask_v = (lane % W != 0).astype(jnp.float32).reshape(1, hw)

    # Element count of cat([grad_h, grad_v], dim=1): (N, 2C, H-1, W).
    count = N * 2 * C * (H - 1) * W
    kernel = functools.partial(
        _l1grad_kernel, w=W, nc=nc, tb=tb, steps_per_core=steps_per_core,
        inv_count=1.0 / count, mask_tail=mask_tail)

    cost = pl.CostEstimate(
        flops=10 * nc * hw,
        transcendentals=0,
        bytes_accessed=2 * nc * hw * p.dtype.itemsize
                       + 2 * hw * 4 + 128 * num_cores * 4,
    )

    out = pl.pallas_call(
        kernel,
        out_shape=jax.ShapeDtypeStruct((1, 128 * num_cores), jnp.float32),
        grid_spec=pltpu.PrefetchScalarGridSpec(
            num_scalar_prefetch=0,
            grid=(num_cores, steps_per_core),
            in_specs=[
                pl.BlockSpec((tb, hw), lambda c, i: (blk_idx(c, i), 0)),
                pl.BlockSpec((tb, hw), lambda c, i: (blk_idx(c, i), 0)),
                pl.BlockSpec((1, hw), lambda c, i: (0, 0)),
                pl.BlockSpec((1, hw), lambda c, i: (0, 0)),
            ],
            out_specs=pl.BlockSpec((1, 128), lambda c, i: (0, c)),
            scratch_shapes=[pltpu.VMEM((tb, acc_cols), jnp.float32)],
        ),
        compiler_params=pltpu.CompilerParams(
            dimension_semantics=("parallel", "arbitrary"),
            vmem_limit_bytes=vmem_limit,
        ),
        cost_estimate=cost,
    )(p, t, mask_h, mask_v)

    # Lane 0 of each core's 128-wide block holds that core's partial sum.
    return jnp.sum(out[0, ::128])


def _reference_l1_grad(prediction, target):
    # Pure-JAX transcription of the PyTorch module, for verification.
    def fast_grad(x):
        gh = (x - jnp.roll(x, 1, axis=-2))[..., 1:, :]
        gv = (x - jnp.roll(x, 1, axis=-1))[..., :, 1:].transpose(0, 1, 3, 2)
        return jnp.concatenate([gh, gv], axis=1)

    return jnp.mean(jnp.abs(fast_grad(prediction) - fast_grad(target)))


if __name__ == "__main__":
    key = jax.random.PRNGKey(0)
    kp, kt = jax.random.split(key)
    N, C, H, W = 2, 4, 16, 16
    pred = jax.random.normal(kp, (N, C, H, W), dtype=jnp.float32)
    targ = jax.random.normal(kt, (N, C, H, W), dtype=jnp.float32)

    loss = l1_grad_loss(pred, targ)
    jax.block_until_ready(loss)

    ref = _reference_l1_grad(pred, targ)
    assert jnp.allclose(loss, ref, rtol=1e-5, atol=1e-6), (loss, ref)
    print("KERNEL_OK")
</pallas_src>

<mosaic_0001>
module attributes {stable_mosaic.version = 11 : i64} {
  func.func @_l1grad_kernel(%arg0: i32, %arg1: i32, %arg2: memref<8x256xf32, #tpu.memory_space<vmem>>, %arg3: memref<8x256xf32, #tpu.memory_space<vmem>>, %arg4: memref<1x256xf32, #tpu.memory_space<vmem>>, %arg5: memref<1x256xf32, #tpu.memory_space<vmem>>, %arg6: memref<1x128xf32, #tpu.memory_space<vmem>>, %arg7: memref<8x128xf32, #tpu.memory_space<vmem>>) attributes {dimension_semantics = [#tpu.dimension_semantics<parallel>, #tpu.dimension_semantics<arbitrary>], iteration_bounds = array<i64: 1, 1>, scalar_prefetch = 0 : i64, scratch_operands = 1 : i64, tpu.core_type = #tpu.core_type<tc>, window_params = [{transform_indices = @transform_0, window_bounds = array<i64: 8, 256>}, {transform_indices = @transform_1, window_bounds = array<i64: 8, 256>}, {pipeline_mode = #tpu.pipeline_mode<synchronous>, transform_indices = @transform_2, window_bounds = array<i64: 1, 256>}, {pipeline_mode = #tpu.pipeline_mode<synchronous>, transform_indices = @transform_3, window_bounds = array<i64: 1, 256>}, {transform_indices = @transform_4, window_bounds = array<i64: 1, 128>}]} {
    %c0_i32 = arith.constant 0 : i32
    %0 = arith.cmpi eq, %arg1, %c0_i32 : i32
    %1 = arith.extui %0 : i1 to i32
    %c0_i32_0 = arith.constant 0 : i32
    %2 = arith.cmpi ne, %1, %c0_i32_0 : i32
    scf.if %2 {
      %cst = arith.constant 0.000000e+00 : f32
      %28 = vector.broadcast %cst : f32 to vector<8x128xf32>
      %c0_14 = arith.constant 0 : index
      %c0_15 = arith.constant 0 : index
      %29 = vector.load %arg7[%c0_14, %c0_15] : memref<8x128xf32, #tpu.memory_space<vmem>>, vector<8x128xf32>
      tpu.vector_store %arg7[%c0_14, %c0_15], %28 {strides = array<i32>} : memref<8x128xf32, #tpu.memory_space<vmem>>, vector<8x128xf32>,
    } else {
    }
    %c0 = arith.constant 0 : index
    %c0_1 = arith.constant 0 : index
    %3 = vector.load %arg2[%c0, %c0_1] : memref<8x256xf32, #tpu.memory_space<vmem>>, vector<8x256xf32>
    %c0_2 = arith.constant 0 : index
    %c0_3 = arith.constant 0 : index
    %4 = vector.load %arg3[%c0_2, %c0_3] : memref<8x256xf32, #tpu.memory_space<vmem>>, vector<8x256xf32>
    %5 = arith.subf %3, %4 : vector<8x256xf32>
    %c16_i32 = arith.constant 16 : i32
    %6 = tpu.dynamic_rotate %5 by %c16_i32 dim 1 : vector<8x256xf32>, i32 -> vector<8x256xf32>
    %7 = arith.subf %5, %6 : vector<8x256xf32>
    %8 = math.absf %7 : vector<8x256xf32>
    %c0_4 = arith.constant 0 : index
    %c0_5 = arith.constant 0 : index
    %9 = vector.load %arg4[%c0_4, %c0_5] : memref<1x256xf32, #tpu.memory_space<vmem>>, vector<1x256xf32>
    %10 = vector.broadcast %9 : vector<1x256xf32> to vector<8x256xf32>
    %11 = arith.mulf %8, %10 : vector<8x256xf32>
    %c1_i32 = arith.constant 1 : i32
    %12 = tpu.dynamic_rotate %5 by %c1_i32 dim 1 : vector<8x256xf32>, i32 -> vector<8x256xf32>
    %13 = arith.subf %5, %12 : vector<8x256xf32>
    %14 = math.absf %13 : vector<8x256xf32>
    %c0_6 = arith.constant 0 : index
    %c0_7 = arith.constant 0 : index
    %15 = vector.load %arg5[%c0_6, %c0_7] : memref<1x256xf32, #tpu.memory_space<vmem>>, vector<1x256xf32>
    %16 = vector.broadcast %15 : vector<1x256xf32> to vector<8x256xf32>
    %17 = arith.mulf %14, %16 : vector<8x256xf32>
    %18 = arith.addf %11, %17 : vector<8x256xf32>
    %19 = vector.extract_strided_slice %18 {offsets = [0, 0], sizes = [8, 128], strides = [1, 1]} : vector<8x256xf32> to vector<8x128xf32>
    %20 = vector.extract_strided_slice %18 {offsets = [0, 128], sizes = [8, 128], strides = [1, 1]} : vector<8x256xf32> to vector<8x128xf32>
    %21 = arith.addf %19, %20 : vector<8x128xf32>
    %c0_8 = arith.constant 0 : index
    %c0_9 = arith.constant 0 : index
    %22 = vector.load %arg7[%c0_8, %c0_9] : memref<8x128xf32, #tpu.memory_space<vmem>>, vector<8x128xf32>
    %23 = arith.addf %22, %21 : vector<8x128xf32>
    %c0_10 = arith.constant 0 : index
    %c0_11 = arith.constant 0 : index
    %24 = vector.load %arg7[%c0_10, %c0_11] : memref<8x128xf32, #tpu.memory_space<vmem>>, vector<8x128xf32>
    tpu.vector_store %arg7[%c0_10, %c0_11], %23 {strides = array<i32>} : memref<8x128xf32, #tpu.memory_space<vmem>>, vector<8x128xf32>,
    %c0_i32_12 = arith.constant 0 : i32
    %25 = arith.cmpi eq, %arg1, %c0_i32_12 : i32
    %26 = arith.extui %25 : i1 to i32
    %c0_i32_13 = arith.constant 0 : i32
    %27 = arith.cmpi ne, %26, %c0_i32_13 : i32
    scf.if %27 {
      %c0_14 = arith.constant 0 : index
      %c0_15 = arith.constant 0 : index
      %28 = vector.load %arg7[%c0_14, %c0_15] : memref<8x128xf32, #tpu.memory_space<vmem>>, vector<8x128xf32>
      %cst = arith.constant dense<0.000000e+00> : vector<8xf32>
      %29 = vector.multi_reduction <add>, %28, %cst [1] : vector<8x128xf32> to vector<8xf32>
      %30 = vector.shape_cast %29 : vector<8xf32> to vector<8x1xf32>
      %cst_16 = arith.constant dense<0.000000e+00> : vector<1xf32>
      %31 = vector.multi_reduction <add>, %30, %cst_16 [0] : vector<8x1xf32> to vector<1xf32>
      %32 = vector.shape_cast %31 : vector<1xf32> to vector<1x1xf32>
      %cst_17 = arith.constant 2.6041668E-4 : f32
      %33 = vector.broadcast %cst_17 : f32 to vector<1x1xf32>
      %34 = arith.mulf %32, %33 : vector<1x1xf32>
      %35 = vector.shape_cast %34 : vector<1x1xf32> to vector<1x1xf32>
      %36 = vector.broadcast %35 : vector<1x1xf32> to vector<1x128xf32>
      %c0_18 = arith.constant 0 : index
      %c0_19 = arith.constant 0 : index
      %37 = vector.load %arg6[%c0_18, %c0_19] : memref<1x128xf32, #tpu.memory_space<vmem>>, vector<1x128xf32>
      tpu.vector_store %arg6[%c0_18, %c0_19], %36 {strides = array<i32>} : memref<1x128xf32, #tpu.memory_space<vmem>>, vector<1x128xf32>,
    } else {
    }
    return
  }
  func.func @transform_0(%arg0: i32, %arg1: i32) -> (i32, i32) {
    %c1_i32 = arith.constant 1 : i32
    %0 = arith.muli %arg0, %c1_i32 : i32
    %1 = arith.addi %0, %arg1 : i32
    %c0_i32 = arith.constant 0 : i32
    %c0_i32_0 = arith.constant 0 : i32
    return %1, %c0_i32 : i32, i32
  }
  func.func @transform_1(%arg0: i32, %arg1: i32) -> (i32, i32) {
    %c1_i32 = arith.constant 1 : i32
    %0 = arith.muli %arg0, %c1_i32 : i32
    %1 = arith.addi %0, %arg1 : i32
    %c0_i32 = arith.constant 0 : i32
    %c0_i32_0 = arith.constant 0 : i32
    return %1, %c0_i32 : i32, i32
  }
  func.func @transform_2(%arg0: i32, %arg1: i32) -> (i32, i32) {
    %c0_i32 = arith.constant 0 : i32
    %c0_i32_0 = arith.constant 0 : i32
    %c0_i32_1 = arith.constant 0 : i32
    return %c0_i32, %c0_i32_0 : i32, i32
  }
  func.func @transform_3(%arg0: i32, %arg1: i32) -> (i32, i32) {
    %c0_i32 = arith.constant 0 : i32
    %c0_i32_0 = arith.constant 0 : i32
    %c0_i32_1 = arith.constant 0 : i32
    return %c0_i32, %c0_i32_0 : i32, i32
  }
  func.func @transform_4(%arg0: i32, %arg1: i32) -> (i32, i32) {
    %c0_i32 = arith.constant 0 : i32
    %c0_i32_0 = arith.constant 0 : i32
    return %c0_i32, %arg0 : i32, i32
  }
}

</mosaic_0001>

<bundles_post_ra>
// kernel: tpu_custom_call.1
= control target key start
LH: loop header
LB: loop body
LE: loop exit
PB: predicated region body
PF: predicated region fallthrough
CT: control target
= control target key end

     0   :  { %9 = vsyncpa [#allocation4], 0  ;;  %s312_s0 = inlined_call_operand.hbm [shape: f32[8,256], index: 0, kind: input, shape index: {}]   ;;  %s313_s1 = inlined_call_operand.hbm [shape: f32[8,256], index: 1, kind: input, shape index: {}]   ;;  %s314_s2 = inlined_call_operand.hbm [shape: f32[1,256], index: 2, kind: input, shape index: {}]   ;;  %s315_s3 = inlined_call_operand.vmem [shape: f32[1,256], index: 3, kind: input, shape index: {}]   ;;  %s316_s4 = inlined_call_operand.hbm [shape: f32[1,128], index: 4, kind: output, shape index: {}]  }
   0x1   :  { %10 = vsyncpa [#allocation7], 0  ;;  %s36_s17 = sshll.u32 %s313_s1, 4  ;;  %s37_s17 = int_to_ptr.hbm [resolvable:$true] %s36_s17 }
   0x2   :  { %11 = vsyncpa [#allocation5], 0  ;;  %s266_s18 = smov [#allocation6]   ;;  %s21_s22 = sshll.u32 %s312_s0, 4  ;;  %s22_s22 = int_to_ptr.hbm [resolvable:$true] %s21_s22 }
   0x3   :  { %s38_s19 = sshll.u32 %s266_s18, 4  ;;  %s267_s23 = smov [#allocation3]   ;;  %s39_s19 = int_to_ptr.vmem [resolvable:$true] %s38_s19 }
   0x4   :  { %41 = dma.hbm_to_vmem [thread:$0]  %s37_s17, 256, %s39_s19, [#allocation7]  }
   0x5   :  { %s23_s24 = sshll.u32 %s267_s23, 4  ;;  %s47_s27 = sshll.u32 %s314_s2, 4  ;;  %s24_s24 = int_to_ptr.vmem [resolvable:$true] %s23_s24  ;;  %s48_s27 = int_to_ptr.hbm [resolvable:$true] %s47_s27 }
   0x6   :  { %26 = dma.hbm_to_vmem [thread:$0]  %s22_s22, 256, %s24_s24, [#allocation4]  }
   0x7   :  { %s268_s1 = smov [#allocation8]  }
   0x8   :  { %s49_s28 = sshll.u32 %s268_s1, 4  ;;  %s50_s28 = int_to_ptr.vmem [resolvable:$true] %s49_s28 }
   0x9   :  { %52 = dma.hbm_to_vmem [thread:$0]  %s48_s27, 32, %s50_s28, [#allocation7]  }
   0xa   :  { %260 = dma.done.wait [#allocation4], 256  }
   0xb   :  { %261 = vsyncadd [#allocation4], 4294967040 }
   0xc   :  { %262 = dma.done.wait [#allocation7], 288  }
   0xd   :  { %263 = vsyncadd [#allocation7], 4294967008  ;;  %v74_v0 = vld [vmem:[#allocation3] sm:$0xff]  ;;  %v76_v1 = vld [vmem:[#allocation6] sm:$0xff]  ;;  %s269_s0 = smov 1   ;;  %s270_s29 = smov 16   ;;  %v84_v6 = vlaneseq }
   0xe   :  { %v78_v2 = vsub.f32 %v74_v0, %v76_v1  ;;  %v75_v3 = vld [vmem:[#allocation3 + $0x8] sm:$0xff]  ;;  %v77_v4 = vld [vmem:[#allocation6 + $0x8] sm:$0xff]  ;;  %v93_v10 = vld [vmem:[#allocation8] sm:$0x3]  ;;  %s147_s8 = sshll.u32 %s316_s4, 4  ;;  %s148_s8 = int_to_ptr.hbm [resolvable:$true] %s147_s8 }
   0xf   :  { %v79_v5 = vsub.f32 %v75_v3, %v77_v4  ;;  %v85_v9 = vand.u32 127, %v84_v6  ;;  %v112_v11 = vld [vmem:[%s315_s3] sm:$0x3]  ;;  %v95_v14 = vperm.slane %v93_v10, 0  ;;  %v96_v25 = vperm.slane %v93_v10, 1  ;;  %s271_s3 = smov [#allocation9]  }
  0x10   :  { %101 = vrot.lane.b32.xlu1 %v78_v2, %s269_s0  ;;  %80 = vrot.lane.b32.xlu0 %v78_v2, %s270_s29  ;;  %v114_v15 = vperm.slane %v112_v11, 0  ;;  %v115_v16 = vperm.slane %v112_v11, 1  ;;  %s145_s5 = sshll.u32 %s271_s3, 4  ;;  %s146_s5 = int_to_ptr.vmem [resolvable:$true] %s145_s5 }
  0x11   :  { %vm105_vm0 = vcmp.lt.s32.totalorder %v85_v9, 1  ;;  %vm86_vm1 = vcmp.lt.s32.totalorder %v85_v9, 16 }
  0x18   :  { %103 = vrot.lane.b32.xlu1 %v79_v5, %s269_s0  ;;  %82 = vrot.lane.b32.xlu0 %v79_v5, %s270_s29 }
  0x82   :  { %v102_v7 = vpop.permute.xlu1 %101  ;;  %v81_v8 = vpop.permute.xlu0 %80 }
  0x8a   :  { %v104_v12 = vpop.permute.xlu1 %103  ;;  %v83_v13 = vpop.permute.xlu0 %82 }
  0x8b   :  { %v106_v17 = vsel %vm105_vm0, %v102_v7, %v104_v12  ;;  %v107_v18 = vsel %vm105_vm0, %v104_v12, %v102_v7  ;;  %v87_v19 = vsel %vm86_vm1, %v81_v8, %v83_v13  ;;  %v88_v20 = vsel %vm86_vm1, %v83_v13, %v81_v8 }
  0x8c   :  { %v108_v21 = vsub.f32 %v78_v2, %v107_v18  ;;  %v109_v22 = vsub.f32 %v79_v5, %v106_v17  ;;  %v89_v23 = vsub.f32 %v78_v2, %v88_v20  ;;  %v90_v24 = vsub.f32 %v79_v5, %v87_v19 }
  0x8e   :  { %v110_v26 = vand.u32 2147483647, %v108_v21  ;;  %v111_v27 = vand.u32 2147483647, %v109_v22  ;;  %v91_v28 = vand.u32 2147483647, %v89_v23 }
  0x8f   :  { %v92_v29 = vand.u32 2147483647, %v90_v24 }
  0x90   :  { %v99_v30 = vmul.f32 %v95_v14, %v91_v28  ;;  %v118_v31 = vmul.f32 %v114_v15, %v110_v26  ;;  %v119_v32 = vmul.f32 %v115_v16, %v111_v27 }
  0x91   :  { %v100_v33 = vmul.f32 %v96_v25, %v92_v29 }
  0x92   :  { %v120_v34 = vadd.f32 %v118_v31, %v99_v30 }
  0x93   :  { %v121_v35 = vadd.f32 %v119_v32, %v100_v33 }
  0x95   :  { %v122_v36 = vadd.f32 %v121_v35, %v120_v34 }
  0x97   :  { %130 = vadd.xlane.f32.xlu2 %v122_v36 }
 0x10a   :  { %v131_v37 = vpop.xlane.xlu2 %130 }
 0x10b   :  { %v132_v38 = vrot.slane %v131_v37, 4 }
 0x10d   :  { %v133_v39 = vadd.f32 %v132_v38, %v131_v37 }
 0x10f   :  { %v134_v40 = vrot.slane %v133_v39, 2 }
 0x111   :  { %v135_v41 = vadd.f32 %v134_v40, %v133_v39 }
 0x113   :  { %v136_v42 = vrot.slane %v135_v41, 1 }
 0x115   :  { %v137_v43 = vadd.f32 %v136_v42, %v135_v41 }
 0x117   :  { %v138_v44 = vmul.f32 0.00026041668, %v137_v43 }
 0x119   :  { %139 = vst [vmem:[#allocation9] sm:$0x1] %v138_v44 }
 0x11a   :  { %150 = dma.vmem_to_hbm [thread:$0]  %s146_s5, 16, %s148_s8, [#allocation5]  }
 0x11b   :  { %264 = dma.done.wait [#allocation5], 16  }
 0x11c   :  { %265 = vsyncadd [#allocation5], 4294967280 }
 0x11d   :  { %155 = vsyncpa [#allocation4], 1 }
 0x11e   :  { %156 = vsyncpa [#allocation7], 1 }
 0x11f   :  { %157 = vsyncpa [#allocation5], 1 }

</bundles_post_ra>
